<compile_context>
chip_gen: v6e
topology: v6e:2x2x1
jax: 0.10.0
libtpu: 0.0.40
codegen_flags: <defaults>
</compile_context>

<pallas_src>
import functools

import jax
import jax.numpy as jnp
from jax import lax
from jax.experimental import pallas as pl
from jax.experimental.pallas import tpu as pltpu


def _round_up(x, m):
    return (x + m - 1) // m * m


def _pad_axis(x, size, axis):
    pad = size - x.shape[axis]
    if pad <= 0:
        return x
    widths = [(0, 0)] * x.ndim
    widths[axis] = (0, pad)
    return jnp.pad(x, widths)


# ----------------------------------------------------------------------------
# Fused direct 3x3 conv kernel: 9 tap matmuls over a VMEM-resident padded
# activation block + BN shift + [fused shortcut] + ReLU + gate mask.
# The whole contraction for an output tile happens in one invocation, so there
# is no K grid axis, no scratch accumulator, and no init/finalize epilogue.
# ----------------------------------------------------------------------------
def _conv3x3_kernel(stride, ho, wo, relu, has_mask, sc_mode, *refs):
    refs = list(refs)
    x_refs = [refs.pop(0) for _ in range(stride * stride)]   # phase blocks
    w_ref = refs.pop(0)                                      # (9, Cin, tn)
    shift_ref = refs.pop(0)                                  # (1, tn)
    mask_ref = refs.pop(0) if has_mask else None             # (1, tn)
    sc_x_ref = refs.pop(0) if sc_mode is not None else None
    sc_w_ref = refs.pop(0) if sc_mode == "conv" else None
    o_ref = refs.pop(0)                                      # (Mt, tn)
    assert not refs

    b, _, _, cin = x_refs[0].shape
    m = b * ho * wo
    tn = o_ref.shape[-1]
    s = stride

    acc = jnp.zeros((m, tn), jnp.float32)
    t = 0
    for dy in range(3):
        for dx in range(3):
            ph = (dy % s) * s + (dx % s)
            r0, c0 = dy // s, dx // s
            xt = x_refs[ph][:, r0:r0 + ho, c0:c0 + wo, :]    # (b, ho, wo, cin)
            acc = acc + jnp.dot(xt.reshape(m, cin), w_ref[t],
                                preferred_element_type=jnp.float32)
            t += 1

    y = acc + shift_ref[...]
    if sc_mode == "conv":        # downsample shortcut: one extra tap matmul
        y = y + jnp.dot(sc_x_ref[...], sc_w_ref[...],
                        preferred_element_type=jnp.float32)
    elif sc_mode == "add":       # identity shortcut: direct f32 residual add
        y = y + sc_x_ref[...].astype(jnp.float32)
    if relu:
        y = jnp.maximum(y, 0.0)
    if has_mask:
        y = y * mask_ref[...]
    o_ref[...] = y.astype(o_ref.dtype)


def fused_conv3x3_bn_act(x_nhwc, w_taps, shift, *, stride, mask=None,
                         shortcut=None, relu=True, out_dtype=jnp.float32):
    """3x3 conv (pad=1) + folded-BN shift [+ shortcut] [+ ReLU] [+ gate mask].

    x_nhwc : (N, H, W, Cin)   activations (cast to bf16 here)
    w_taps : (9, Cin, Cp)     per-tap weight columns, BN scale folded in
    shift  : (Cp,)            folded BN shift (f32)
    mask   : (Cp,) or None    per-channel gate applied after ReLU
    shortcut:
        None
        ("add",  res2d)          res2d (N*Ho*Wo, Cp) f32 added before ReLU
        ("conv", sc_x2d, sc_w)   sc_x2d (N*Ho*Wo, Ksc), sc_w (Ksc, Cp); the
                                 shortcut BN shift must be folded into `shift`.
    Returns (out2d of shape (N*Ho*Wo, Cp), (Ho, Wo)).
    """
    N, H, W, Cin = x_nhwc.shape
    T, Cin_w, Cp = w_taps.shape
    assert T == 9 and Cin_w == Cin
    s = int(stride)
    Ho = (H + 2 - 3) // s + 1
    Wo = (W + 2 - 3) // s + 1
    M = N * Ho * Wo

    # Spatial zero-pad (+1 each side, rounded up so padded dims divide s),
    # then a 1x-sized phase decomposition: for stride>1 every tap becomes a
    # contiguous static slice of one phase array (no im2col slab in HBM).
    Hp, Wp = _round_up(H + 2, s), _round_up(W + 2, s)
    xp = jnp.pad(x_nhwc, ((0, 0), (1, Hp - H - 1), (1, Wp - W - 1), (0, 0)))
    xp = xp.astype(jnp.bfloat16)
    phases = [xp[:, py::s, px::s, :] for py in range(s) for px in range(s)]
    Hs, Ws = Hp // s, Wp // s

    # Output-channel tile (lane-dense whenever Cp is a multiple of 128).
    if Cp <= 512:
        tn = Cp
    else:
        tn = max(t for t in (512, 384, 256, 128) if Cp % t == 0)

    # Batch tile: largest divisor of N that keeps the per-step VMEM footprint
    # ~<=20 MiB (v7x-safe), keeps the M tile 8-aligned, and leaves >=2 grid
    # blocks when possible so both v7x TensorCores get work.
    def est_bytes(b):
        m = b * Ho * Wo
        bts = 2 * b * Hp * Wp * Cin * 2                        # phases (dbl buf)
        bts += 2 * 9 * Cin * tn * 2                            # weights (dbl buf)
        bts += m * tn * 4                                      # f32 accumulator
        bts += 2 * m * Cin * 2                                 # tap temporaries
        bts += 2 * m * tn * jnp.dtype(out_dtype).itemsize      # out (dbl buf)
        if shortcut is not None:
            sc_arr = shortcut[1]
            bts += 2 * m * sc_arr.shape[-1] * sc_arr.dtype.itemsize
            if shortcut[0] == "conv":
                bts += 2 * sc_arr.shape[-1] * tn * 2
        return bts

    cands = [b for b in range(1, N + 1)
             if N % b == 0 and ((b * Ho * Wo) % 8 == 0 or b == N)
             and est_bytes(b) <= (20 << 20)]
    if not cands:
        cands = [N]
    pref = [b for b in cands if N // b >= 2]
    B = max(pref) if pref else max(cands)
    Mt = B * Ho * Wo
    grid = (N // B, Cp // tn)

    inputs = list(phases)
    in_specs = [pl.BlockSpec((B, Hs, Ws, Cin), lambda i, j: (i, 0, 0, 0))
                for _ in range(s * s)]
    inputs.append(w_taps.astype(jnp.bfloat16))
    in_specs.append(pl.BlockSpec((9, Cin, tn), lambda i, j: (0, 0, j)))
    inputs.append(shift.reshape(1, Cp).astype(jnp.float32))
    in_specs.append(pl.BlockSpec((1, tn), lambda i, j: (0, j)))

    has_mask = mask is not None
    if has_mask:
        inputs.append(mask.reshape(1, Cp).astype(jnp.float32))
        in_specs.append(pl.BlockSpec((1, tn), lambda i, j: (0, j)))

    sc_mode = None if shortcut is None else shortcut[0]
    flops = 2 * M * 9 * Cin * Cp
    if sc_mode == "add":
        inputs.append(shortcut[1].astype(jnp.float32))
        in_specs.append(pl.BlockSpec((Mt, tn), lambda i, j: (i, j)))
    elif sc_mode == "conv":
        sc_x, sc_w = shortcut[1], shortcut[2]
        ksc = sc_x.shape[-1]
        inputs.append(sc_x.astype(jnp.bfloat16))
        in_specs.append(pl.BlockSpec((Mt, ksc), lambda i, j: (i, 0)))
        inputs.append(sc_w.astype(jnp.bfloat16))
        in_specs.append(pl.BlockSpec((ksc, tn), lambda i, j: (0, j)))
        flops += 2 * M * ksc * Cp

    bytes_accessed = sum(int(a.size) * a.dtype.itemsize for a in inputs)
    bytes_accessed += M * Cp * jnp.dtype(out_dtype).itemsize

    kernel = functools.partial(_conv3x3_kernel, s, Ho, Wo, relu, has_mask,
                               sc_mode)
    out2d = pl.pallas_call(
        kernel,
        out_shape=jax.ShapeDtypeStruct((M, Cp), out_dtype),
        grid=grid,
        in_specs=in_specs,
        out_specs=pl.BlockSpec((Mt, tn), lambda i, j: (i, j)),
        compiler_params=pltpu.CompilerParams(
            dimension_semantics=("parallel", "parallel"),
            vmem_limit_bytes=48 * 1024 * 1024),
        cost_estimate=pl.CostEstimate(flops=int(flops), transcendentals=0,
                                      bytes_accessed=int(bytes_accessed)),
    )(*inputs)
    return out2d, (Ho, Wo)


# ----------------------------------------------------------------------------
# Glue: BN folding, weight layout, parameter init, gate masks
# ----------------------------------------------------------------------------
def bn_fold(bn_params, eps=1e-5):
    gamma, beta, mean, var = bn_params
    scale = gamma / jnp.sqrt(var + eps)
    shift = beta - mean * scale
    return scale, shift


def conv_weight_taps(w_oihw, scale, cin_pad=None, cout_pad=None):
    """(Cout, Cin, 3, 3) OIHW -> (9, Cin[_pad], Cout[_pad]) per-tap columns
    with the folded BN scale applied to the output channels."""
    cout, cin, kh, kw = w_oihw.shape
    w = jnp.transpose(w_oihw, (2, 3, 1, 0)).reshape(kh * kw, cin, cout)
    w = w * scale[None, None, :]
    if cout_pad is not None:
        w = _pad_axis(w, cout_pad, 2)
    if cin_pad is not None:
        w = _pad_axis(w, cin_pad, 1)
    return w


def init_basic_block(key, in_channels, out_channels, strides, num_tasks):
    keys = jax.random.split(key, 8)

    def conv_w(k, cout, cin, kh, kw):
        fan_in = cin * kh * kw
        bound = 1.0 / (fan_in ** 0.5)
        return jax.random.uniform(k, (cout, cin, kh, kw), jnp.float32,
                                  -bound, bound)

    def bn_p(k, c):
        k1, k2, k3, k4 = jax.random.split(k, 4)
        gamma = jax.random.uniform(k1, (c,), jnp.float32, 0.5, 1.5)
        beta = 0.1 * jax.random.normal(k2, (c,), jnp.float32)
        mean = 0.1 * jax.random.normal(k3, (c,), jnp.float32)
        var = jax.random.uniform(k4, (c,), jnp.float32, 0.5, 1.5)
        return (gamma, beta, mean, var)

    params = {
        "w1": conv_w(keys[0], out_channels, in_channels, 3, 3),
        "bn1": bn_p(keys[1], out_channels),
        "w2": conv_w(keys[2], out_channels, out_channels, 3, 3),
        "bn2": bn_p(keys[3], out_channels),
        "ec1": jax.random.normal(keys[6], (num_tasks, out_channels), jnp.float32),
        "ec2": jax.random.normal(keys[7], (num_tasks, out_channels), jnp.float32),
    }
    if strides != 1:
        params["w_sc"] = conv_w(keys[4], out_channels, in_channels, 1, 1)
        params["bn_sc"] = bn_p(keys[5], out_channels)
    return params


def block_masks(params, t, s=1.0):
    """Equivalent of BasicBlock.mask(t, s): sigmoid(s * Embedding(t))."""
    gc1 = jax.nn.sigmoid(s * params["ec1"][t])
    gc2 = jax.nn.sigmoid(s * params["ec2"][t])
    return [gc1, gc2]


# ----------------------------------------------------------------------------
# BasicBlock forward (Pallas-backed)
# ----------------------------------------------------------------------------
def basic_block_forward(params, x_nchw, masks, strides):
    gc1, gc2 = masks[0], masks[1]
    cout, cin = params["w1"].shape[0], params["w1"].shape[1]
    # Pad channels to a lane multiple only when they are already >= 128;
    # small channel counts stay exact width (full-dim blocks are legal).
    cp = cout if cout < 128 else _round_up(cout, 128)

    # NCHW -> NHWC once at the block boundary (see TODO at top of file).
    x = jnp.transpose(x_nchw, (0, 2, 3, 1))
    N, H, W, _ = x.shape

    # conv1: 3x3 stride=strides pad=1 -> BN -> ReLU -> gate mask gc1 (bf16 out)
    s1, b1 = bn_fold(params["bn1"])
    w1_taps = conv_weight_taps(params["w1"], s1, cout_pad=cp)
    out1_2d, (Ho, Wo) = fused_conv3x3_bn_act(
        x, w1_taps, _pad_axis(b1, cp, 0), stride=strides,
        mask=_pad_axis(gc1, cp, 0), relu=True, out_dtype=jnp.bfloat16)
    out1 = out1_2d.reshape(N, Ho, Wo, cp)

    # Shortcut branch, fused into the conv2 kernel.
    s2, b2 = bn_fold(params["bn2"])
    if strides != 1:
        s_sc, b_sc = bn_fold(params["bn_sc"])
        w_sc = params["w_sc"][:, :, 0, 0].T * s_sc[None, :]          # (cin, cout)
        w_sc = _pad_axis(w_sc, cp, 1)
        x_sub = x[:, ::strides, ::strides, :][:, :Ho, :Wo, :]
        shortcut = ("conv", x_sub.reshape(N * Ho * Wo, cin), w_sc)
        shift2 = _pad_axis(b2 + b_sc, cp, 0)       # fold shortcut BN shift in
    else:
        assert cin == cout, "identity shortcut requires C_in == C_out"
        res = _pad_axis(x, cp, 3).reshape(N * Ho * Wo, cp).astype(jnp.float32)
        shortcut = ("add", res)
        shift2 = _pad_axis(b2, cp, 0)

    # conv2: 3x3 stride=1 pad=1 -> BN -> (+ shortcut) -> ReLU -> gate mask gc2
    w2_taps = conv_weight_taps(params["w2"], s2, cin_pad=cp, cout_pad=cp)
    out2_2d, _ = fused_conv3x3_bn_act(
        out1, w2_taps, shift2, stride=1, mask=_pad_axis(gc2, cp, 0),
        relu=True, shortcut=shortcut, out_dtype=jnp.float32)

    out = out2_2d.reshape(N, Ho, Wo, cp)[..., :cout]
    return jnp.transpose(out, (0, 3, 1, 2))        # NHWC -> NCHW


# ----------------------------------------------------------------------------
# Pure-JAX reference (for correctness check only)
# ----------------------------------------------------------------------------
def ref_forward(params, x_nchw, masks, strides):
    def conv(x, w, stride, pad):
        return lax.conv_general_dilated(
            x, w, (stride, stride), [(pad, pad), (pad, pad)],
            dimension_numbers=("NCHW", "OIHW", "NCHW"))

    def bn(x, p, eps=1e-5):
        g, b, m, v = p
        return ((x - m[None, :, None, None])
                / jnp.sqrt(v[None, :, None, None] + eps)
                * g[None, :, None, None] + b[None, :, None, None])

    out = jax.nn.relu(bn(conv(x_nchw, params["w1"], strides, 1), params["bn1"]))
    out = out * masks[0][None, :, None, None]
    out2 = bn(conv(out, params["w2"], 1, 1), params["bn2"])
    if strides != 1:
        sc = bn(conv(x_nchw, params["w_sc"], strides, 0), params["bn_sc"])
    else:
        sc = x_nchw
    out = jax.nn.relu(out2 + sc)
    out = out * masks[1][None, :, None, None]
    return out


def _check(out, ref, shape):
    assert out.shape == shape, out.shape
    max_err = float(jnp.max(jnp.abs(out - ref)))
    tol = 0.05 * (float(jnp.max(jnp.abs(ref))) + 1.0)   # bf16-matmul tolerance
    assert max_err < tol, f"max abs error {max_err} (tol {tol})"


if __name__ == "__main__":
    key = jax.random.PRNGKey(0)
    num_tasks, task_id = 3, 1
    kp1, kx1, kp2, kx2 = jax.random.split(key, 4)

    # Case 1: strided block (downsample) with fused 1x1-conv shortcut.
    in_c, out_c, strides = 4, 8, 2
    N, H, W = 2, 16, 16
    params = init_basic_block(kp1, in_c, out_c, strides, num_tasks)
    x = jax.random.normal(kx1, (N, in_c, H, W), jnp.float32)
    masks = block_masks(params, task_id, s=1.0)
    out = jax.block_until_ready(basic_block_forward(params, x, masks, strides))
    _check(out, ref_forward(params, x, masks, strides),
           (N, out_c, H // strides, W // strides))

    # Case 2: stride-1 block with fused identity (f32 residual-add) shortcut.
    in_c2 = out_c2 = 8
    strides2 = 1
    params2 = init_basic_block(kp2, in_c2, out_c2, strides2, num_tasks)
    x2 = jax.random.normal(kx2, (N, in_c2, H, W), jnp.float32)
    masks2 = block_masks(params2, task_id, s=1.0)
    out2 = jax.block_until_ready(
        basic_block_forward(params2, x2, masks2, strides2))
    _check(out2, ref_forward(params2, x2, masks2, strides2), (N, out_c2, H, W))

    print("KERNEL_OK")
</pallas_src>

<mosaic_0001>
module attributes {stable_mosaic.version = 11 : i64} {
  func.func @_conv3x3_kernel(%arg0: i32, %arg1: i32, %arg2: memref<1x9x9x4xbf16, #tpu.memory_space<vmem>>, %arg3: memref<1x9x9x4xbf16, #tpu.memory_space<vmem>>, %arg4: memref<1x9x9x4xbf16, #tpu.memory_space<vmem>>, %arg5: memref<1x9x9x4xbf16, #tpu.memory_space<vmem>>, %arg6: memref<9x4x8xbf16, #tpu.memory_space<vmem>>, %arg7: memref<1x8xf32, #tpu.memory_space<vmem>>, %arg8: memref<1x8xf32, #tpu.memory_space<vmem>>, %arg9: memref<64x8xbf16, #tpu.memory_space<vmem>>) attributes {dimension_semantics = [#tpu.dimension_semantics<parallel>, #tpu.dimension_semantics<parallel>], iteration_bounds = array<i64: 2, 1>, scalar_prefetch = 0 : i64, scratch_operands = 0 : i64, tpu.core_type = #tpu.core_type<tc>, window_params = [{transform_indices = @transform_0, window_bounds = array<i64: 1, 9, 9, 4>}, {transform_indices = @transform_1, window_bounds = array<i64: 1, 9, 9, 4>}, {transform_indices = @transform_2, window_bounds = array<i64: 1, 9, 9, 4>}, {transform_indices = @transform_3, window_bounds = array<i64: 1, 9, 9, 4>}, {transform_indices = @transform_4, window_bounds = array<i64: 9, 4, 8>}, {transform_indices = @transform_5, window_bounds = array<i64: 1, 8>}, {transform_indices = @transform_6, window_bounds = array<i64: 1, 8>}, {transform_indices = @transform_7, window_bounds = array<i64: 64, 8>}]} {
    %cst = arith.constant 0.000000e+00 : f32
    %0 = vector.broadcast %cst : f32 to vector<64x8xf32>
    %c0 = arith.constant 0 : index
    %c0_0 = arith.constant 0 : index
    %c0_1 = arith.constant 0 : index
    %c0_2 = arith.constant 0 : index
    %1 = vector.load %arg2[%c0, %c0_0, %c0_1, %c0_2] : memref<1x9x9x4xbf16, #tpu.memory_space<vmem>>, vector<1x8x8x4xbf16>
    %2 = vector.shape_cast %1 : vector<1x8x8x4xbf16> to vector<64x4xbf16>
    %c0_3 = arith.constant 0 : index
    %c0_4 = arith.constant 0 : index
    %c0_5 = arith.constant 0 : index
    %3 = vector.load %arg6[%c0_3, %c0_4, %c0_5] : memref<9x4x8xbf16, #tpu.memory_space<vmem>>, vector<1x4x8xbf16>
    %4 = vector.shape_cast %3 : vector<1x4x8xbf16> to vector<4x8xbf16>
    %cst_6 = arith.constant dense<0.000000e+00> : vector<64x8xf32>
    %5 = tpu.matmul %2, %4, %cst_6 {dimension_numbers = #tpu.dot_dimension_numbers<[1], [0], [0], [1], [0, 0, 1, 1], [], []>} : vector<64x4xbf16>, vector<4x8xbf16>, vector<64x8xf32> -> vector<64x8xf32>
    %6 = arith.addf %0, %5 : vector<64x8xf32>
    %c0_7 = arith.constant 0 : index
    %c0_8 = arith.constant 0 : index
    %c0_9 = arith.constant 0 : index
    %c0_10 = arith.constant 0 : index
    %7 = vector.load %arg3[%c0_7, %c0_8, %c0_9, %c0_10] : memref<1x9x9x4xbf16, #tpu.memory_space<vmem>>, vector<1x8x8x4xbf16>
    %8 = vector.shape_cast %7 : vector<1x8x8x4xbf16> to vector<64x4xbf16>
    %c1 = arith.constant 1 : index
    %c0_11 = arith.constant 0 : index
    %c0_12 = arith.constant 0 : index
    %9 = vector.load %arg6[%c1, %c0_11, %c0_12] : memref<9x4x8xbf16, #tpu.memory_space<vmem>>, vector<1x4x8xbf16>
    %10 = vector.shape_cast %9 : vector<1x4x8xbf16> to vector<4x8xbf16>
    %cst_13 = arith.constant dense<0.000000e+00> : vector<64x8xf32>
    %11 = tpu.matmul %8, %10, %cst_13 {dimension_numbers = #tpu.dot_dimension_numbers<[1], [0], [0], [1], [0, 0, 1, 1], [], []>} : vector<64x4xbf16>, vector<4x8xbf16>, vector<64x8xf32> -> vector<64x8xf32>
    %12 = arith.addf %6, %11 : vector<64x8xf32>
    %c0_14 = arith.constant 0 : index
    %c0_15 = arith.constant 0 : index
    %c1_16 = arith.constant 1 : index
    %c0_17 = arith.constant 0 : index
    %13 = vector.load %arg2[%c0_14, %c0_15, %c1_16, %c0_17] : memref<1x9x9x4xbf16, #tpu.memory_space<vmem>>, vector<1x8x8x4xbf16>
    %14 = vector.shape_cast %13 : vector<1x8x8x4xbf16> to vector<64x4xbf16>
    %c2 = arith.constant 2 : index
    %c0_18 = arith.constant 0 : index
    %c0_19 = arith.constant 0 : index
    %15 = vector.load %arg6[%c2, %c0_18, %c0_19] : memref<9x4x8xbf16, #tpu.memory_space<vmem>>, vector<1x4x8xbf16>
    %16 = vector.shape_cast %15 : vector<1x4x8xbf16> to vector<4x8xbf16>
    %cst_20 = arith.constant dense<0.000000e+00> : vector<64x8xf32>
    %17 = tpu.matmul %14, %16, %cst_20 {dimension_numbers = #tpu.dot_dimension_numbers<[1], [0], [0], [1], [0, 0, 1, 1], [], []>} : vector<64x4xbf16>, vector<4x8xbf16>, vector<64x8xf32> -> vector<64x8xf32>
    %18 = arith.addf %12, %17 : vector<64x8xf32>
    %c0_21 = arith.constant 0 : index
    %c0_22 = arith.constant 0 : index
    %c0_23 = arith.constant 0 : index
    %c0_24 = arith.constant 0 : index
    %19 = vector.load %arg4[%c0_21, %c0_22, %c0_23, %c0_24] : memref<1x9x9x4xbf16, #tpu.memory_space<vmem>>, vector<1x8x8x4xbf16>
    %20 = vector.shape_cast %19 : vector<1x8x8x4xbf16> to vector<64x4xbf16>
    %c3 = arith.constant 3 : index
    %c0_25 = arith.constant 0 : index
    %c0_26 = arith.constant 0 : index
    %21 = vector.load %arg6[%c3, %c0_25, %c0_26] : memref<9x4x8xbf16, #tpu.memory_space<vmem>>, vector<1x4x8xbf16>
    %22 = vector.shape_cast %21 : vector<1x4x8xbf16> to vector<4x8xbf16>
    %cst_27 = arith.constant dense<0.000000e+00> : vector<64x8xf32>
    %23 = tpu.matmul %20, %22, %cst_27 {dimension_numbers = #tpu.dot_dimension_numbers<[1], [0], [0], [1], [0, 0, 1, 1], [], []>} : vector<64x4xbf16>, vector<4x8xbf16>, vector<64x8xf32> -> vector<64x8xf32>
    %24 = arith.addf %18, %23 : vector<64x8xf32>
    %c0_28 = arith.constant 0 : index
    %c0_29 = arith.constant 0 : index
    %c0_30 = arith.constant 0 : index
    %c0_31 = arith.constant 0 : index
    %25 = vector.load %arg5[%c0_28, %c0_29, %c0_30, %c0_31] : memref<1x9x9x4xbf16, #tpu.memory_space<vmem>>, vector<1x8x8x4xbf16>
    %26 = vector.shape_cast %25 : vector<1x8x8x4xbf16> to vector<64x4xbf16>
    %c4 = arith.constant 4 : index
    %c0_32 = arith.constant 0 : index
    %c0_33 = arith.constant 0 : index
    %27 = vector.load %arg6[%c4, %c0_32, %c0_33] : memref<9x4x8xbf16, #tpu.memory_space<vmem>>, vector<1x4x8xbf16>
    %28 = vector.shape_cast %27 : vector<1x4x8xbf16> to vector<4x8xbf16>
    %cst_34 = arith.constant dense<0.000000e+00> : vector<64x8xf32>
    %29 = tpu.matmul %26, %28, %cst_34 {dimension_numbers = #tpu.dot_dimension_numbers<[1], [0], [0], [1], [0, 0, 1, 1], [], []>} : vector<64x4xbf16>, vector<4x8xbf16>, vector<64x8xf32> -> vector<64x8xf32>
    %30 = arith.addf %24, %29 : vector<64x8xf32>
    %c0_35 = arith.constant 0 : index
    %c0_36 = arith.constant 0 : index
    %c1_37 = arith.constant 1 : index
    %c0_38 = arith.constant 0 : index
    %31 = vector.load %arg4[%c0_35, %c0_36, %c1_37, %c0_38] : memref<1x9x9x4xbf16, #tpu.memory_space<vmem>>, vector<1x8x8x4xbf16>
    %32 = vector.shape_cast %31 : vector<1x8x8x4xbf16> to vector<64x4xbf16>
    %c5 = arith.constant 5 : index
    %c0_39 = arith.constant 0 : index
    %c0_40 = arith.constant 0 : index
    %33 = vector.load %arg6[%c5, %c0_39, %c0_40] : memref<9x4x8xbf16, #tpu.memory_space<vmem>>, vector<1x4x8xbf16>
    %34 = vector.shape_cast %33 : vector<1x4x8xbf16> to vector<4x8xbf16>
    %cst_41 = arith.constant dense<0.000000e+00> : vector<64x8xf32>
    %35 = tpu.matmul %32, %34, %cst_41 {dimension_numbers = #tpu.dot_dimension_numbers<[1], [0], [0], [1], [0, 0, 1, 1], [], []>} : vector<64x4xbf16>, vector<4x8xbf16>, vector<64x8xf32> -> vector<64x8xf32>
    %36 = arith.addf %30, %35 : vector<64x8xf32>
    %c0_42 = arith.constant 0 : index
    %c1_43 = arith.constant 1 : index
    %c0_44 = arith.constant 0 : index
    %c0_45 = arith.constant 0 : index
    %37 = vector.load %arg2[%c0_42, %c1_43, %c0_44, %c0_45] : memref<1x9x9x4xbf16, #tpu.memory_space<vmem>>, vector<1x8x8x4xbf16>
    %38 = vector.shape_cast %37 : vector<1x8x8x4xbf16> to vector<64x4xbf16>
    %c6 = arith.constant 6 : index
    %c0_46 = arith.constant 0 : index
    %c0_47 = arith.constant 0 : index
    %39 = vector.load %arg6[%c6, %c0_46, %c0_47] : memref<9x4x8xbf16, #tpu.memory_space<vmem>>, vector<1x4x8xbf16>
    %40 = vector.shape_cast %39 : vector<1x4x8xbf16> to vector<4x8xbf16>
    %cst_48 = arith.constant dense<0.000000e+00> : vector<64x8xf32>
    %41 = tpu.matmul %38, %40, %cst_48 {dimension_numbers = #tpu.dot_dimension_numbers<[1], [0], [0], [1], [0, 0, 1, 1], [], []>} : vector<64x4xbf16>, vector<4x8xbf16>, vector<64x8xf32> -> vector<64x8xf32>
    %42 = arith.addf %36, %41 : vector<64x8xf32>
    %c0_49 = arith.constant 0 : index
    %c1_50 = arith.constant 1 : index
    %c0_51 = arith.constant 0 : index
    %c0_52 = arith.constant 0 : index
    %43 = vector.load %arg3[%c0_49, %c1_50, %c0_51, %c0_52] : memref<1x9x9x4xbf16, #tpu.memory_space<vmem>>, vector<1x8x8x4xbf16>
    %44 = vector.shape_cast %43 : vector<1x8x8x4xbf16> to vector<64x4xbf16>
    %c7 = arith.constant 7 : index
    %c0_53 = arith.constant 0 : index
    %c0_54 = arith.constant 0 : index
    %45 = vector.load %arg6[%c7, %c0_53, %c0_54] : memref<9x4x8xbf16, #tpu.memory_space<vmem>>, vector<1x4x8xbf16>
    %46 = vector.shape_cast %45 : vector<1x4x8xbf16> to vector<4x8xbf16>
    %cst_55 = arith.constant dense<0.000000e+00> : vector<64x8xf32>
    %47 = tpu.matmul %44, %46, %cst_55 {dimension_numbers = #tpu.dot_dimension_numbers<[1], [0], [0], [1], [0, 0, 1, 1], [], []>} : vector<64x4xbf16>, vector<4x8xbf16>, vector<64x8xf32> -> vector<64x8xf32>
    %48 = arith.addf %42, %47 : vector<64x8xf32>
    %c0_56 = arith.constant 0 : index
    %c1_57 = arith.constant 1 : index
    %c1_58 = arith.constant 1 : index
    %c0_59 = arith.constant 0 : index
    %49 = vector.load %arg2[%c0_56, %c1_57, %c1_58, %c0_59] : memref<1x9x9x4xbf16, #tpu.memory_space<vmem>>, vector<1x8x8x4xbf16>
    %50 = vector.shape_cast %49 : vector<1x8x8x4xbf16> to vector<64x4xbf16>
    %c8 = arith.constant 8 : index
    %c0_60 = arith.constant 0 : index
    %c0_61 = arith.constant 0 : index
    %51 = vector.load %arg6[%c8, %c0_60, %c0_61] : memref<9x4x8xbf16, #tpu.memory_space<vmem>>, vector<1x4x8xbf16>
    %52 = vector.shape_cast %51 : vector<1x4x8xbf16> to vector<4x8xbf16>
    %cst_62 = arith.constant dense<0.000000e+00> : vector<64x8xf32>
    %53 = tpu.matmul %50, %52, %cst_62 {dimension_numbers = #tpu.dot_dimension_numbers<[1], [0], [0], [1], [0, 0, 1, 1], [], []>} : vector<64x4xbf16>, vector<4x8xbf16>, vector<64x8xf32> -> vector<64x8xf32>
    %54 = arith.addf %48, %53 : vector<64x8xf32>
    %c0_63 = arith.constant 0 : index
    %c0_64 = arith.constant 0 : index
    %55 = vector.load %arg7[%c0_63, %c0_64] : memref<1x8xf32, #tpu.memory_space<vmem>>, vector<1x8xf32>
    %56 = vector.broadcast %55 : vector<1x8xf32> to vector<64x8xf32>
    %57 = arith.addf %54, %56 : vector<64x8xf32>
    %cst_65 = arith.constant 0.000000e+00 : f32
    %58 = vector.broadcast %cst_65 : f32 to vector<64x8xf32>
    %59 = arith.maximumf %57, %58 : vector<64x8xf32>
    %c0_66 = arith.constant 0 : index
    %c0_67 = arith.constant 0 : index
    %60 = vector.load %arg8[%c0_66, %c0_67] : memref<1x8xf32, #tpu.memory_space<vmem>>, vector<1x8xf32>
    %61 = vector.broadcast %60 : vector<1x8xf32> to vector<64x8xf32>
    %62 = arith.mulf %59, %61 : vector<64x8xf32>
    %63 = arith.truncf %62 : vector<64x8xf32> to vector<64x8xbf16>
    %c0_68 = arith.constant 0 : index
    %c0_69 = arith.constant 0 : index
    %64 = vector.load %arg9[%c0_68, %c0_69] : memref<64x8xbf16, #tpu.memory_space<vmem>>, vector<64x8xbf16>
    tpu.vector_store %arg9[%c0_68, %c0_69], %63 {strides = array<i32>} : memref<64x8xbf16, #tpu.memory_space<vmem>>, vector<64x8xbf16>,
    return
  }
  func.func @transform_0(%arg0: i32, %arg1: i32) -> (i32, i32, i32, i32) {
    %c0_i32 = arith.constant 0 : i32
    %c0_i32_0 = arith.constant 0 : i32
    %c0_i32_1 = arith.constant 0 : i32
    %c0_i32_2 = arith.constant 0 : i32
    return %arg0, %c0_i32, %c0_i32_0, %c0_i32_1 : i32, i32, i32, i32
  }
  func.func @transform_1(%arg0: i32, %arg1: i32) -> (i32, i32, i32, i32) {
    %c0_i32 = arith.constant 0 : i32
    %c0_i32_0 = arith.constant 0 : i32
    %c0_i32_1 = arith.constant 0 : i32
    %c0_i32_2 = arith.constant 0 : i32
    return %arg0, %c0_i32, %c0_i32_0, %c0_i32_1 : i32, i32, i32, i32
  }
  func.func @transform_2(%arg0: i32, %arg1: i32) -> (i32, i32, i32, i32) {
    %c0_i32 = arith.constant 0 : i32
    %c0_i32_0 = arith.constant 0 : i32
    %c0_i32_1 = arith.constant 0 : i32
    %c0_i32_2 = arith.constant 0 : i32
    return %arg0, %c0_i32, %c0_i32_0, %c0_i32_1 : i32, i32, i32, i32
  }
  func.func @transform_3(%arg0: i32, %arg1: i32) -> (i32, i32, i32, i32) {
    %c0_i32 = arith.constant 0 : i32
    %c0_i32_0 = arith.constant 0 : i32
    %c0_i32_1 = arith.constant 0 : i32
    %c0_i32_2 = arith.constant 0 : i32
    return %arg0, %c0_i32, %c0_i32_0, %c0_i32_1 : i32, i32, i32, i32
  }
  func.func @transform_4(%arg0: i32, %arg1: i32) -> (i32, i32, i32) {
    %c0_i32 = arith.constant 0 : i32
    %c0_i32_0 = arith.constant 0 : i32
    %c0_i32_1 = arith.constant 0 : i32
    return %c0_i32, %c0_i32_0, %arg1 : i32, i32, i32
  }
  func.func @transform_5(%arg0: i32, %arg1: i32) -> (i32, i32) {
    %c0_i32 = arith.constant 0 : i32
    %c0_i32_0 = arith.constant 0 : i32
    return %c0_i32, %arg1 : i32, i32
  }
  func.func @transform_6(%arg0: i32, %arg1: i32) -> (i32, i32) {
    %c0_i32 = arith.constant 0 : i32
    %c0_i32_0 = arith.constant 0 : i32
    return %c0_i32, %arg1 : i32, i32
  }
  func.func @transform_7(%arg0: i32, %arg1: i32) -> (i32, i32) {
    %c0_i32 = arith.constant 0 : i32
    return %arg0, %arg1 : i32, i32
  }
}

</mosaic_0001>

<bundles_post_ra>
// kernel: tpu_custom_call.1
= control target key start
LH: loop header
LB: loop body
LE: loop exit
PB: predicated region body
PF: predicated region fallthrough
CT: control target
= control target key end

     0   :  { %s2429_s24 = smov 0   ;;  %s2431_s25 = smov 0   ;;  %s2770_s0 = inlined_call_operand.vmem [shape: bf16[2,9,9,4], index: 0, kind: input, shape index: {}]   ;;  %s2771_s1 = inlined_call_operand.vmem [shape: bf16[2,9,9,4], index: 1, kind: input, shape index: {}]   ;;  %s2772_s2 = inlined_call_operand.vmem [shape: bf16[2,9,9,4], index: 2, kind: input, shape index: {}]   ;;  %s2773_s3 = inlined_call_operand.vmem [shape: bf16[2,9,9,4], index: 3, kind: input, shape index: {}]   ;;  %s2774_s4 = inlined_call_operand.vmem [shape: bf16[9,4,8], index: 4, kind: input, shape index: {}]   ;;  %s2775_s5 = inlined_call_operand.vmem [shape: f32[1,8], index: 5, kind: input, shape index: {}]   ;;  %s2776_s6 = inlined_call_operand.vmem [shape: f32[1,8], index: 6, kind: input, shape index: {}]   ;;  %s2777_s7 = inlined_call_operand.vmem [shape: bf16[128,8], index: 7, kind: output, shape index: {}]  }
   0x1   :  { %s2433_s26 = smov 0  }
   0x2 LB: > { %s29_s27 = sadd.s32 1, %s2383_s25  ;;  %p2030_p0 = scmp.ge.s32.totalorder %s2387_s26, 1  ;;  %s2387_s26 = sphi %s2433_s26, %s17_s26   ;;  %s2383_s25 = sphi %s2431_s25, %s2782_s25   ;;  %s2379_s24 = sphi %s2429_s24, %s2781_s24  }
   0x3   : > { %p31_p1 = scmp.ge.s32.totalorder %s29_s27, 2  ;;  %p306_p2 = scmp.lt.s32.totalorder %s2387_s26, 3 }
   0x5   : > { %s2784_s27 = smov (%p31_p1, %s29_s27), 0  ;;  %p307_p3 = pnand %p2030_p0, %p306_p2 }
   0x6   : > { %p366_p4 = scmp.lt.s32.totalorder (!%p307_p3), %s2379_s24, 1 }
   0x7   : > { %310 = sbr.rel (%p307_p3) target bundleno = 304 (0x130), region = 48 }
   0xc   : > { %v2037_v0 = vld [vmem:[%s2774_s4 + $0x2] sm:$0x3]  ;;  %vm458_vm0 = vcmask 1041408   ;;  %v414_v2 = vld [vmem:[%s2774_s4] sm:$0x3]  ;;  %s367_s11 = scalar_select %p366_p4, %s2379_s24, 1 }
   0xd   : > { %2307 = vmatprep.subr.msk.bf16.mxu1 %vm458_vm0, %v2037_v0  ;;  %2306 = vmatprep.subr.msk.bf16.mxu0 %vm458_vm0, %v2037_v0  ;;  %v460_v1 = vsel %vm458_vm0, %v2037_v0, 0  ;;  %v2054_v3 = vld [vmem:[%s2774_s4 + $0x4] sm:$0x3]  ;;  %vm445_vm1 = vcmask 31744   ;;  %v560_v4 = vsel %vm458_vm0, %v414_v2, 0  ;;  %vm1864_vm5 = vcmask 60416  }
   0xe   : > { %2305 = vmatpush3.bf16.msra.mxu1 %v460_v1  ;;  %2215 = vmatpush3.bf16.msra.mxu0 %v460_v1  ;;  %s2465_s12 = smul.u32 72, %s367_s11  ;;  %v785_v5 = vsel %vm458_vm0, %v2054_v3, 0  ;;  %v2063_v7 = vld [vmem:[%s2774_s4 + $0x6] sm:$0x3]  ;;  %v2072_v8 = vld [vmem:[%s2774_s4 + $0x8] sm:$0x3] }
   0xf   : > { %2308 = vmatprep.subr.msk.bf16.mxu1 %vm458_vm0, %v414_v2  ;;  %2309 = vmatprep.subr.msk.bf16.mxu0 %vm458_vm0, %v2054_v3  ;;  %vm643_vm2 = vsmask.f32 3328  ;;  %vm644_vm3 = vsmask.f32 7440  ;;  %v903_v13 = vsel %vm458_vm0, %v2063_v7, 0  ;;  %v2498_v14 = vsel %vm458_vm0, %v2072_v8, 0 }
  0x10   : > { %s2471_s15 = scalar_lea.vmem %s2771_s1, %s2465_s12  ;;  %s2489_s22 = scalar_lea.vmem %s2770_s0, %s2465_s12  ;;  %v2515_v38 = vld [vmem:[%s2774_s4 + $0xa] sm:$0x3]  ;;  %vm2519_vm4 = vmor %vm643_vm2, %vm644_vm3 }
  0x11   : > { %v2341_v6 = vld [vmem:[%s2471_s15] ss:$8 sps:$4 sm:$0xff]   ;;  %v2343_v10 = vld [vmem:[%s2471_s15 + $0x10] ss:$8 sps:$4 sm:$0xff]   ;;  %v628_v16 = vld [vmem:[%s2489_s22 + $0x4] sm:$0x1]  ;;  %s2552_s10 = scalar_lea.vmem %s2772_s2, %s2465_s12  ;;  %s2568_s14 = scalar_lea.vmem %s2773_s3, %s2465_s12 }
  0x12   : > { %v2342_v9 = vld [vmem:[%s2471_s15 + $0x20] ss:$8 sps:$4 sm:$0xff]   ;;  %2216 = vmatprep.mubr.msk.bf16.mxu0 %vm445_vm1, %v2341_v6  ;;  %v2344_v11 = vld [vmem:[%s2471_s15 + $0x30] ss:$8 sps:$4 sm:$0xff]   ;;  %v630_v19 = vld [vmem:[%s2489_s22 + $0xc] sm:$0x1] }
  0x13   : > { %2220 = vmatprep.mubr.msk.bf16.mxu1 %vm445_vm1, %v2342_v9  ;;  %2217 = vmatmul.mubr.msk.bf16.vlgmr.msra.gmra.mxu0 %vm445_vm1, %v2343_v10  ;;  %v2345_v12 = vld [vmem:[%s2489_s22] ss:$8 sps:$4 sm:$0xff]   ;;  %v2346_v18 = vld [vmem:[%s2489_s22 + $0x10] ss:$8 sps:$4 sm:$0xff]   ;;  %v656_v22 = vshll.u32 %v628_v16, 16  ;;  %v670_v25 = vshll.u32 %v630_v19, 16 }
  0x14   : > { %2221 = vmatmul.mubr.msk.bf16.vlgmr.msra.gmra.mxu1 %vm445_vm1, %v2344_v11  ;;  %2235 = vmatpush3.bf16.msra.mxu0 %v785_v5  ;;  %v627_v15 = vld [vmem:[%s2489_s22] sm:$0xf]  ;;  %v629_v17 = vld [vmem:[%s2489_s22 + $0x8] sm:$0xf]  ;;  %v631_v26 = vld [vmem:[%s2489_s22 + $0x10] sm:$0xf] }
  0x15   : > { %2225 = vmatpush3.bf16.msra.mxu1 %v560_v4  ;;  %2226 = vmatprep.mubr.msk.bf16.mxu1 %vm445_vm1, %v2345_v12  ;;  %v647_v20 = vshrl.u32 %v627_v15, 16  ;;  %v650_v21 = vshll.u32 %v627_v15, 16  ;;  %v661_v23 = vshrl.u32 %v629_v17, 16  ;;  %v664_v24 = vshll.u32 %v629_v17, 16  ;;  %v632_v27 = vld [vmem:[%s2489_s22 + $0x14] sm:$0x1] }
  0x16   : > { %2310 = vmatprep.subr.msk.bf16.mxu1 %vm458_vm0, %v2063_v7  ;;  %2311 = vmatprep.subr.msk.bf16.mxu0 %vm458_vm0, %v2072_v8  ;;  %v658_v30 = vrot.slane %v656_v22, 5  ;;  %v633_v32 = vld [vmem:[%s2489_s22 + $0x18] sm:$0xf]  ;;  %v672_v34 = vrot.slane %v670_v25, 5  ;;  %v634_v35 = vld [vmem:[%s2489_s22 + $0x1c] sm:$0x1] }
  0x17   : > { %v649_v28 = vrot.slane %v647_v20, 4  ;;  %v652_v29 = vrot.slane %v650_v21, 5  ;;  %v663_v31 = vrot.slane %v661_v23, 4  ;;  %v666_v33 = vrot.slane %v664_v24, 5  ;;  %v2347_v52 = vld [vmem:[%s2489_s22 + $0x20] ss:$8 sps:$4 sm:$0xff]  }
  0x18   : > { %v675_v36 = vshrl.u32 %v631_v26, 16  ;;  %v678_v37 = vshll.u32 %v631_v26, 16  ;;  %v684_v40 = vshll.u32 %v632_v27, 16  ;;  %v689_v41 = vshrl.u32 %v633_v32, 16  ;;  %v2348_v58 = vld [vmem:[%s2489_s22 + $0x30] ss:$8 sps:$4 sm:$0xff]  }
  0x19   : > { %v653_v39 = vor.u32 %v652_v29, %v649_v28  ;;  %v692_v42 = vshll.u32 %v633_v32, 16  ;;  %v667_v44 = vor.u32 %v666_v33, %v663_v31  ;;  %v698_v47 = vshll.u32 %v634_v35, 16  ;;  %v635_v59 = vld [vmem:[%s2489_s22 + $0x20] sm:$0xf]  ;;  %v636_v60 = vld [vmem:[%s2489_s22 + $0x24] sm:$0x1] }
  0x1a   : > { %v677_v45 = vrot.slane %v675_v36, 4  ;;  %v680_v46 = vrot.slane %v678_v37, 5  ;;  %v686_v49 = vrot.slane %v684_v40, 5  ;;  %v691_v50 = vrot.slane %v689_v41, 4  ;;  %v637_v63 = vld [vmem:[%s2489_s22 + $0x28] sm:$0xf] }
  0x1b   : > { %v654_v48 = vrot.slane %v653_v39, 4  ;;  %v694_v51 = vrot.slane %v692_v42, 5  ;;  %v668_v53 = vrot.slane %v667_v44, 4  ;;  %v700_v55 = vrot.slane %v698_v47, 5  ;;  %v638_v0 = vld [vmem:[%s2489_s22 + $0x2c] sm:$0x1] }
  0x1c   : > { %2227 = vmatmul.mubr.msk.bf16.vlgmr.msra.gmra.mxu1 %vm445_vm1, %v2346_v18  ;;  %v681_v54 = vor.u32 %v680_v46, %v677_v45  ;;  %v703_v1 = vshrl.u32 %v635_v59, 16  ;;  %v706_v4 = vshll.u32 %v635_v59, 16  ;;  %v712_v5 = vshll.u32 %v636_v60, 16  ;;  %v639_v6 = vld [vmem:[%s2489_s22 + $0x30] sm:$0xf] }
  0x1d   : > { %2245 = vmatpush3.bf16.msra.mxu1 %v903_v13  ;;  %v659_v56 = vsel %vm2519_vm4, %v654_v48, %v658_v30  ;;  %v695_v57 = vor.u32 %v694_v51, %v691_v50  ;;  %2230 = vmatprep.mubr.msk.bf16.mxu1 %vm445_vm1, %v2347_v52  ;;  %v673_v61 = vsel %vm2519_vm4, %v668_v53, %v672_v34  ;;  %v717_v9 = vshrl.u32 %v637_v63, 16  ;;  %v640_v11 = vld [vmem:[%s2489_s22 + $0x34] sm:$0x1]  ;;  %v641_v17 = vld [vmem:[%s2489_s22 + $0x38] sm:$0xf] }
  0x1e   : > { %2312 = vmatprep.subr.msk.bf16.mxu1 %vm458_vm0, %v2515_v38  ;;  %v682_v62 = vrot.slane %v681_v54, 4  ;;  %v2055_v2 = vcombine.low %v659_v56, %v673_v61  ;;  %v705_v8 = vrot.slane %v703_v1, 4  ;;  %v720_v10 = vshll.u32 %v637_v63, 16  ;;  %v2098_v18 = vld [vmem:[%s2774_s4 + $0xc] sm:$0x3] }
  0x1f   : > { %v696_v3 = vrot.slane %v695_v57, 4  ;;  %v708_v13 = vrot.slane %v706_v4, 5  ;;  %v714_v15 = vrot.slane %v712_v5, 5  ;;  %v726_v16 = vshll.u32 %v638_v0, 16  ;;  %v642_v22 = vld [vmem:[%s2489_s22 + $0x3c] sm:$0x1] }
  0x20   : > { %v687_v7 = vsel %vm2519_vm4, %v682_v62, %v686_v49  ;;  %2236 = vmatprep.mubr.msk.bf16.mxu0 %vm445_vm1, %v2055_v2  ;;  %v719_v20 = vrot.slane %v717_v9, 4  ;;  %v722_v21 = vrot.slane %v720_v10, 5  ;;  %v731_v23 = vshrl.u32 %v639_v6, 16  ;;  %v2349_v35 = vld [vmem:[%s2552_s10] ss:$8 sps:$4 sm:$0xff]  }
  0x21   : > { %v701_v12 = vsel %vm2519_vm4, %v696_v3, %v700_v55  ;;  %v709_v24 = vor.u32 %v708_v13, %v705_v8  ;;  %v728_v25 = vrot.slane %v726_v16, 5  ;;  %v734_v26 = vshll.u32 %v639_v6, 16  ;;  %v2350_v44 = vld [vmem:[%s2552_s10 + $0x10] ss:$8 sps:$4 sm:$0xff]   ;;  %v2115_v51 = vld [vmem:[%s2774_s4 + $0xe] sm:$0x3] }
  0x22   : > { %v2056_v19 = vcombine.low %v687_v7, %v701_v12  ;;  %v740_v27 = vshll.u32 %v640_v11, 16  ;;  %v723_v28 = vor.u32 %v722_v21, %v719_v20  ;;  %v733_v29 = vrot.slane %v731_v23, 4  ;;  %v2353_v53 = vld [vmem:[%s2552_s10 + $0x20] ss:$8 sps:$4 sm:$0xff]   ;;  %v2354_v57 = vld [vmem:[%s2552_s10 + $0x30] ss:$8 sps:$4 sm:$0xff]  }
  0x23   : > { %v745_v30 = vshrl.u32 %v641_v17, 16  ;;  %v748_v31 = vshll.u32 %v641_v17, 16  ;;  %v710_v32 = vrot.slane %v709_v24, 4  ;;  %v736_v33 = vrot.slane %v734_v26, 5  ;;  %v1097_v59 = vld [vmem:[%s2552_s10 + $0x4] sm:$0x1] }
  0x24   : > { %2231 = vmatmul.mubr.msk.bf16.gmra.mxu1 %vm445_vm1, %v2348_v58  ;;  %2237 = vmatmul.mubr.msk.bf16.vlgmr.msra.gmra.mxu0 %vm445_vm1, %v2056_v19  ;;  %v754_v34 = vshll.u32 %v642_v22, 16  ;;  %v724_v36 = vrot.slane %v723_v28, 4  ;;  %v742_v42 = vrot.slane %v740_v27, 5  ;;  %v1251_v49 = vsel %vm458_vm0, %v2515_v38, 0  ;;  %v2351_v38 = vld [vmem:[%s2568_s14] ss:$8 sps:$4 sm:$0xff]  }
  0x25   : > { %2255 = vmatpush3.bf16.msra.mxu0 %v2498_v14  ;;  %v747_v37 = vrot.slane %v745_v30, 4  ;;  %v750_v39 = vrot.slane %v748_v31, 5  ;;  %v715_v40 = vsel %vm2519_vm4, %v710_v32, %v714_v15  ;;  %v737_v41 = vor.u32 %v736_v33, %v733_v29  ;;  %2246 = vmatprep.mubr.msk.bf16.mxu1 %vm445_vm1, %v2349_v35  ;;  %v1096_v58 = vld [vmem:[%s2552_s10] sm:$0xf]  ;;  %v1098_v60 = vld [vmem:[%s2552_s10 + $0x8] sm:$0xf] }
  0x26   : > { %2313 = vmatprep.subr.msk.bf16.mxu0 %vm458_vm0, %v2098_v18  ;;  %v729_v14 = vsel %vm2519_vm4, %v724_v36, %v728_v25  ;;  %v756_v46 = vrot.slane %v754_v34, 5  ;;  %v1370_v56 = vsel %vm458_vm0, %v2098_v18, 0  ;;  %v1099_v61 = vld [vmem:[%s2552_s10 + $0xc] sm:$0x1]  ;;  %v1113_v62 = vshrl.u32 %v1096_v58, 16 }
  0x27   : > { %v751_v45 = vor.u32 %v750_v39, %v747_v37  ;;  %v2057_v47 = vcombine.low %v715_v40, %v729_v14  ;;  %v738_v48 = vrot.slane %v737_v41, 4  ;;  %v1116_v63 = vshll.u32 %v1096_v58, 16  ;;  %v1100_v2 = vld [vmem:[%s2552_s10 + $0x10] sm:$0xf]  ;;  %v1101_v6 = vld [vmem:[%s2552_s10 + $0x14] sm:$0x1] }
  0x28   : > { %v1122_v0 = vshll.u32 %v1097_v59, 16  ;;  %v1127_v1 = vshrl.u32 %v1098_v60, 16  ;;  %v2352_v3 = vld [vmem:[%s2568_s14 + $0x10] ss:$8 sps:$4 sm:$0xff]   ;;  %v1130_v4 = vshll.u32 %v1098_v60, 16  ;;  %v1136_v5 = vshll.u32 %v1099_v61, 16 }
  0x29   : > { %v752_v50 = vrot.slane %v751_v45, 4  ;;  %2240 = vmatprep.mubr.msk.bf16.mxu0 %vm445_vm1, %v2057_v47  ;;  %v743_v52 = vsel %vm2519_vm4, %v738_v48, %v742_v42  ;;  %v1102_v7 = vld [vmem:[%s2552_s10 + $0x18] sm:$0xf]  ;;  %v2355_v8 = vld [vmem:[%s2568_s14 + $0x20] ss:$8 sps:$4 sm:$0xff]   ;;  %v1115_v9 = vrot.slane %v1113_v62, 4 }
  0x2a   : > { %v1118_v10 = vrot.slane %v1116_v63, 5  ;;  %v1124_v11 = vrot.slane %v1122_v0, 5  ;;  %v1129_v12 = vrot.slane %v1127_v1, 4  ;;  %v1103_v13 = vld [vmem:[%s2552_s10 + $0x1c] sm:$0x1]  ;;  %v1132_v15 = vrot.slane %v1130_v4, 5 }
  0x2b   : > { %v757_v54 = vsel %vm2519_vm4, %v752_v50, %v756_v46  ;;  %v1138_v16 = vrot.slane %v1136_v5, 5  ;;  %v1141_v17 = vshrl.u32 %v1100_v2, 16  ;;  %v1144_v18 = vshll.u32 %v1100_v2, 16  ;;  %v2605_v27 = vld [vmem:[%s2774_s4 + $0x10] sm:$0x3] }
  0x2c   : > { %2247 = vmatmul.mubr.msk.bf16.vlgmr.msra.gmra.mxu1 %vm445_vm1, %v2350_v44  ;;  %v2058_v55 = vcombine.low %v743_v52, %v757_v54  ;;  %v1119_v19 = vor.u32 %v1118_v10, %v1115_v9  ;;  %v1150_v20 = vshll.u32 %v1101_v6, 16  ;;  %v1155_v21 = vshrl.u32 %v1102_v7, 16  ;;  %v1104_v39 = vld [vmem:[%s2552_s10 + $0x20] sm:$0xf]  ;;  %v1105_v40 = vld [vmem:[%s2552_s10 + $0x24] sm:$0x1] }
  0x2d   : > { %2265 = vmatpush3.bf16.msra.mxu1 %v1251_v49  ;;  %2250 = vmatprep.mubr.msk.bf16.mxu1 %vm445_vm1, %v2353_v53  ;;  %v1158_v22 = vshll.u32 %v1102_v7, 16  ;;  %v1133_v23 = vor.u32 %v1132_v15, %v1129_v12  ;;  %v1143_v24 = vrot.slane %v1141_v17, 4  ;;  %v1146_v25 = vrot.slane %v1144_v18, 5  ;;  %v1106_v41 = vld [vmem:[%s2552_s10 + $0x28] sm:$0xf] }
  0x2e   : > { %2314 = vmatprep.subr.msk.bf16.mxu1 %vm458_vm0, %v2115_v51  ;;  %2241 = vmatmul.mubr.msk.bf16.gmra.mxu0 %vm445_vm1, %v2058_v55  ;;  %v1164_v26 = vshll.u32 %v1103_v13, 16  ;;  %v1120_v28 = vrot.slane %v1119_v19, 4  ;;  %v1157_v29 = vrot.slane %v1155_v21, 4  ;;  %v1489_v31 = vsel %vm458_vm0, %v2115_v51, 0  ;;  %v2356_v42 = vld [vmem:[%s2568_s14 + $0x30] ss:$8 sps:$4 sm:$0xff]  }
  0x2f   : > { %2256 = vmatprep.mubr.msk.bf16.mxu0 %vm445_vm1, %v2351_v38  ;;  %v1160_v30 = vrot.slane %v1158_v22, 5  ;;  %v1134_v32 = vrot.slane %v1133_v23, 4  ;;  %v1147_v33 = vor.u32 %v1146_v25, %v1143_v24  ;;  %v1152_v34 = vrot.slane %v1150_v20, 5  ;;  %v1107_v45 = vld [vmem:[%s2552_s10 + $0x2c] sm:$0x1] }
  0x30   : > { %v1166_v35 = vrot.slane %v1164_v26, 5  ;;  %v1125_v36 = vsel %vm2519_vm4, %v1120_v28, %v1124_v11  ;;  %v1169_v46 = vshrl.u32 %v1104_v39, 16  ;;  %v1172_v47 = vshll.u32 %v1104_v39, 16  ;;  %v2357_v50 = vld [vmem:[%s2489_s22 + $0x8] ss:$8 sps:$4 sm:$0xff]  }
  0x31   : > { %v1161_v37 = vor.u32 %v1160_v30, %v1157_v29  ;;  %v1139_v44 = vsel %vm2519_vm4, %v1134_v32, %v1138_v16  ;;  %v1148_v14 = vrot.slane %v1147_v33, 4  ;;  %v1178_v51 = vshll.u32 %v1105_v40, 16  ;;  %v1108_v53 = vld [vmem:[%s2552_s10 + $0x30] sm:$0xf]  ;;  %v1110_v62 = vld [vmem:[%s2552_s10 + $0x38] sm:$0xf] }
  0x32   : > { %v2082_v48 = vcombine.low %v1125_v36, %v1139_v44  ;;  %v1183_v52 = vshrl.u32 %v1106_v41, 16  ;;  %v1171_v38 = vrot.slane %v1169_v46, 4  ;;  %v1174_v55 = vrot.slane %v1172_v47, 5  ;;  %v1111_v2 = vld [vmem:[%s2552_s10 + $0x3c] sm:$0x1] }
  0x33   : > { %v1162_v49 = vrot.slane %v1161_v37, 4  ;;  %v1153_v54 = vsel %vm2519_vm4, %v1148_v14, %v1152_v34  ;;  %v1180_v59 = vrot.slane %v1178_v51, 5  ;;  %v1192_v61 = vshll.u32 %v1107_v45, 16  ;;  %v2358_v16 = vld [vmem:[%s2489_s22 + $0x18] ss:$8 sps:$4 sm:$0xff]  }
  0x34   : > { %2251 = vmatmul.mubr.msk.bf16.gmra.mxu1 %vm445_vm1, %v2354_v57  ;;  %v1109_v57 = vld [vmem:[%s2552_s10 + $0x34] sm:$0x1]  ;;  %v1185_v60 = vrot.slane %v1183_v52, 4  ;;  %v1175_v0 = vor.u32 %v1174_v55, %v1171_v38  ;;  %v1200_v5 = vshll.u32 %v1108_v53, 16  ;;  %v1211_v7 = vshrl.u32 %v1110_v62, 16 }
  0x35   : > { %2266 = vmatprep.mubr.msk.bf16.mxu1 %vm445_vm1, %v2082_v48  ;;  %v1167_v58 = vsel %vm2519_vm4, %v1162_v49, %v1166_v35  ;;  %v1194_v4 = vrot.slane %v1192_v61, 5  ;;  %v1206_v6 = vshll.u32 %v1109_v57, 16  ;;  %v1214_v11 = vshll.u32 %v1110_v62, 16  ;;  %v2359_v29 = vld [vmem:[%s2489_s22 + $0x28] ss:$8 sps:$4 sm:$0xff]  }
  0x36   : > { %2257 = vmatmul.mubr.msk.bf16.vlgmr.msra.gmra.mxu0 %vm445_vm1, %v2352_v3  ;;  %v2083_v63 = vcombine.low %v1153_v54, %v1167_v58  ;;  %v1197_v3 = vshrl.u32 %v1108_v53, 16  ;;  %v1202_v12 = vrot.slane %v1200_v5, 5  ;;  %v1213_v13 = vrot.slane %v1211_v7, 4  ;;  %v2124_v30 = vld [vmem:[%s2489_s22 + $0x8] sm:$0xf] }
  0x37   : > { %2275 = vmatpush3.bf16.msra.mxu0 %v1370_v56  ;;  %2260 = vmatprep.mubr.msk.bf16.mxu0 %vm445_vm1, %v2355_v8  ;;  %v1186_v56 = vshll.u32 %v1106_v41, 16  ;;  %v1176_v8 = vrot.slane %v1175_v0, 4  ;;  %v1220_v15 = vshll.u32 %v1111_v2, 16  ;;  %v1216_v19 = vrot.slane %v1214_v11, 5  ;;  %v2361_v32 = vld [vmem:[%s2471_s15 + $0x8] ss:$8 sps:$4 sm:$0xff]  }
  0x38   : > { %2315 = vmatprep.subr.msk.bf16.mxu0 %vm458_vm0, %v2605_v27  ;;  %v1199_v10 = vrot.slane %v1197_v3, 4  ;;  %v1208_v21 = vrot.slane %v1206_v6, 5  ;;  %v1719_v25 = vsel %vm458_vm0, %v2605_v27, 0  ;;  %v2125_v33 = vld [vmem:[%s2489_s22 + $0xc] sm:$0x1]  ;;  %v1581_v35 = vshrl.u32 %v2124_v30, 16 }
  0x39   : > { %v1188_v1 = vrot.slane %v1186_v56, 5  ;;  %v1181_v17 = vsel %vm2519_vm4, %v1176_v8, %v1180_v59  ;;  %v1217_v23 = vor.u32 %v1216_v19, %v1213_v13  ;;  %v1222_v24 = vrot.slane %v1220_v15, 5  ;;  %v2126_v34 = vld [vmem:[%s2489_s22 + $0x10] sm:$0xf]  ;;  %v2127_v37 = vld [vmem:[%s2489_s22 + $0x14] sm:$0x1] }
  0x3a   : > { %v1203_v20 = vor.u32 %v1202_v12, %v1199_v10  ;;  %v1584_v39 = vshll.u32 %v2124_v30, 16  ;;  %v1590_v27 = vshll.u32 %v2125_v33, 16  ;;  %v1595_v40 = vshrl.u32 %v2126_v34, 16  ;;  %v2128_v45 = vld [vmem:[%s2489_s22 + $0x18] sm:$0xf] }
  0x3b   : > { %v1189_v9 = vor.u32 %v1188_v1, %v1185_v60  ;;  %v1598_v44 = vshll.u32 %v2126_v34, 16  ;;  %v1604_v14 = vshll.u32 %v2127_v37, 16  ;;  %v2360_v51 = vld [vmem:[%s2489_s22 + $0x38] ss:$8 sps:$4 sm:$0xff]   ;;  %v2131_v38 = vld [vmem:[%s2489_s22 + $0x24] sm:$0x1] }
  0x3c   : > { %2267 = vmatmul.mubr.msk.bf16.vlgmr.msra.gmra.mxu1 %vm445_vm1, %v2083_v63  ;;  %v1204_v28 = vrot.slane %v1203_v20, 4  ;;  %v1586_v47 = vrot.slane %v1584_v39, 5  ;;  %v1592_v48 = vrot.slane %v1590_v27, 5  ;;  %v1597_v49 = vrot.slane %v1595_v40, 4  ;;  %v2130_v54 = vld [vmem:[%s2489_s22 + $0x20] sm:$0xf] }
  0x3d   : > { %2285 = vmatpush3.bf16.msra.mxu1 %v1489_v31  ;;  %v1190_v18 = vrot.slane %v1189_v9, 4  ;;  %v1218_v31 = vrot.slane %v1217_v23, 4  ;;  %v1600_v52 = vrot.slane %v1598_v44, 5  ;;  %v1606_v53 = vrot.slane %v1604_v14, 5  ;;  %v2362_v63 = vld [vmem:[%s2471_s15 + $0x18] ss:$8 sps:$4 sm:$0xff]  }
  0x3e   : > { %2261 = vmatmul.mubr.msk.bf16.gmra.mxu0 %vm445_vm1, %v2356_v42  ;;  %v1209_v36 = vsel %vm2519_vm4, %v1204_v28, %v1208_v21  ;;  %v1583_v42 = vrot.slane %v1581_v35, 4  ;;  %v1609_v56 = vshrl.u32 %v2128_v45, 16  ;;  %v1612_v57 = vshll.u32 %v2128_v45, 16  ;;  %v2363_v6 = vld [vmem:[%s2471_s15 + $0x28] ss:$8 sps:$4 sm:$0xff]  }
  0x3f   : > { %2276 = vmatprep.mubr.msk.bf16.mxu0 %vm445_vm1, %v2357_v50  ;;  %v1195_v22 = vsel %vm2519_vm4, %v1190_v18, %v1194_v4  ;;  %v1223_v41 = vsel %vm2519_vm4, %v1218_v31, %v1222_v24  ;;  %v2129_v50 = vld [vmem:[%s2489_s22 + $0x1c] sm:$0x1]  ;;  %v1601_v59 = vor.u32 %v1600_v52, %v1597_v49  ;;  %v1623_v60 = vshrl.u32 %v2130_v54, 16  ;;  %v2132_v11 = vld [vmem:[%s2489_s22 + $0x28] sm:$0xf] }
  0x40   : > { %v2084_v26 = vcombine.low %v1181_v17, %v1195_v22  ;;  %v2085_v46 = vcombine.low %v1209_v36, %v1223_v41  ;;  %v1587_v55 = vor.u32 %v1586_v47, %v1583_v42  ;;  %v1618_v58 = vshll.u32 %v2129_v50, 16  ;;  %v2133_v15 = vld [vmem:[%s2489_s22 + $0x2c] sm:$0x1]  ;;  %v2135_v17 = vld [vmem:[%s2489_s22 + $0x34] sm:$0x1] }
  0x41   : > { %v1626_v61 = vshll.u32 %v2130_v54, 16  ;;  %v1632_v62 = vshll.u32 %v2131_v38, 16  ;;  %v1611_v1 = vrot.slane %v1609_v56, 4  ;;  %v1614_v2 = vrot.slane %v1612_v57, 5  ;;  %v2136_v22 = vld [vmem:[%s2489_s22 + $0x38] sm:$0xf] }
  0x42   : > { %2270 = vmatprep.mubr.msk.bf16.mxu1 %vm445_vm1, %v2084_v26  ;;  %v1588_v0 = vrot.slane %v1587_v55, 4  ;;  %v1602_v3 = vrot.slane %v1601_v59, 4  ;;  %v1625_v4 = vrot.slane %v1623_v60, 4  ;;  %v1620_v9 = vrot.slane %v1618_v58, 5  ;;  %v2137_v28 = vld [vmem:[%s2489_s22 + $0x3c] sm:$0x1] }
  0x43   : > { %v1628_v5 = vrot.slane %v1626_v61, 5  ;;  %v1615_v8 = vor.u32 %v1614_v2, %v1611_v1  ;;  %v1634_v10 = vrot.slane %v1632_v62, 5  ;;  %v1637_v20 = vshrl.u32 %v2132_v11, 16  ;;  %v2138_v33 = vld [vmem:[%s2489_s22 + $0x40] sm:$0xf] }
  0x44   : > { %2271 = vmatmul.mubr.msk.bf16.gmra.mxu1 %vm445_vm1, %v2085_v46  ;;  %v1593_v7 = vsel %vm2519_vm4, %v1588_v0, %v1592_v48  ;;  %v1607_v12 = vsel %vm2519_vm4, %v1602_v3, %v1606_v53  ;;  %v1640_v21 = vshll.u32 %v2132_v11, 16  ;;  %v1646_v24 = vshll.u32 %v2133_v15, 16  ;;  %v2139_v39 = vld [vmem:[%s2489_s22 + $0x44] sm:$0x1]  ;;  %v2364_v47 = vld [vmem:[%s2471_s15 + $0x38] ss:$8 sps:$4 sm:$0xff]  }
  0x45   : > { %2286 = vmatprep.mubr.msk.bf16.mxu1 %vm445_vm1, %v2361_v32  ;;  %v1629_v13 = vor.u32 %v1628_v5, %v1625_v4  ;;  %v2141_v18 = vcombine.low %v1593_v7, %v1607_v12  ;;  %v1616_v19 = vrot.slane %v1615_v8, 4  ;;  %v1639_v30 = vrot.slane %v1637_v20, 4  ;;  %s2035_s15 = sshll.u32 %s2379_s24, 3 }
  0x46   : > { %2277 = vmatmul.mubr.msk.bf16.vlgmr.msra.gmra.mxu0 %vm445_vm1, %v2358_v16  ;;  %v2134_v16 = vld [vmem:[%s2489_s22 + $0x30] sm:$0xf]  ;;  %v1642_v31 = vrot.slane %v1640_v21, 5  ;;  %v1660_v32 = vshll.u32 %v2135_v17, 16  ;;  %v1648_v35 = vrot.slane %v1646_v24, 5  ;;  %v1665_v42 = vshrl.u32 %v2136_v22, 16 }
  0x47   : > { %2295 = vmatpush3.bf16.msra.mxu0 %v1719_v25  ;;  %2280 = vmatprep.mubr.msk.bf16.mxu0 %vm445_vm1, %v2359_v29  ;;  %v1630_v23 = vrot.slane %v1629_v13, 4  ;;  %v1651_v25 = vshrl.u32 %v2134_v16, 16  ;;  %v1654_v26 = vshll.u32 %v2134_v16, 16  ;;  %v1621_v29 = vsel %vm2519_vm4, %v1616_v19, %v1620_v9  ;;  %p2711_p5 = scmp.lt.s32.totalorder %s2035_s15, 15 }
  0x48   : > { %v1643_v40 = vor.u32 %v1642_v31, %v1639_v30  ;;  %v1662_v41 = vrot.slane %v1660_v32, 5  ;;  %v1668_v14 = vshll.u32 %v2136_v22, 16  ;;  %v1674_v45 = vshll.u32 %v2137_v28, 16 }
  0x49   : > { %v1635_v34 = vsel %vm2519_vm4, %v1630_v23, %v1634_v10  ;;  %v1653_v36 = vrot.slane %v1651_v25, 4  ;;  %v1656_v37 = vrot.slane %v1654_v26, 5  ;;  %v1679_v46 = vshrl.u32 %v2138_v33, 16  ;;  %s2786_s15 = smov (!%p2711_p5, %s2035_s15), 15 }
  0x4a   : > { %v2142_v27 = vcombine.low %v1621_v29, %v1635_v34  ;;  %v1644_v48 = vrot.slane %v1643_v40, 4  ;;  %v1667_v49 = vrot.slane %v1665_v42, 4  ;;  %v1682_v50 = vshll.u32 %v2138_v33, 16  ;;  %s2036_s23 = sshll.u32 %s2786_s15, 2 }
  0x4b   : > { %v1657_v44 = vor.u32 %v1656_v37, %v1653_v36  ;;  %v1670_v53 = vrot.slane %v1668_v14, 5  ;;  %v1681_v54 = vrot.slane %v1679_v46, 4  ;;  %v1676_v58 = vrot.slane %v1674_v45, 5  ;;  %s2738_s30 = scalar_lea.vmem %s2777_s7, %s2036_s23 }
  0x4c   : > { %2287 = vmatmul.mubr.msk.bf16.vlgmr.msra.gmra.mxu1 %vm445_vm1, %v2362_v63  ;;  %v1649_v38 = vsel %vm2519_vm4, %v1644_v48, %v1648_v35  ;;  %v1684_v55 = vrot.slane %v1682_v50, 5 }
  0x4d   : > { %2290 = vmatprep.mubr.msk.bf16.mxu1 %vm445_vm1, %v2363_v6  ;;  %v1658_v52 = vrot.slane %v1657_v44, 4  ;;  %v1671_v57 = vor.u32 %v1670_v53, %v1667_v49 }
  0x4e   : > { %2281 = vmatmul.mubr.msk.bf16.gmra.mxu0 %vm445_vm1, %v2360_v51  ;;  %v1688_v51 = vshll.u32 %v2139_v39, 16  ;;  %v1685_v60 = vor.u32 %v1684_v55, %v1681_v54 }
  0x4f   : > { %2296 = vmatprep.mubr.msk.bf16.mxu0 %vm445_vm1, %v2141_v18  ;;  %v1663_v56 = vsel %vm2519_vm4, %v1658_v52, %v1662_v41  ;;  %v1672_v62 = vrot.slane %v1671_v57, 4 }
  0x50   : > { %v2143_v59 = vcombine.low %v1649_v38, %v1663_v56  ;;  %v1690_v61 = vrot.slane %v1688_v51, 5  ;;  %v1686_v63 = vrot.slane %v1685_v60, 4 }
  0x51   : > { %v1677_v0 = vsel %vm2519_vm4, %v1672_v62, %v1676_v58 }
  0x52   : > { %v1691_v1 = vsel %vm2519_vm4, %v1686_v63, %v1690_v61 }
  0x53   : > { %v2144_v2 = vcombine.low %v1677_v0, %v1691_v1 }
  0x54   : > { %2291 = vmatmul.mubr.msk.bf16.gmra.mxu1 %vm445_vm1, %v2364_v47 }
  0x56   : > { %2297 = vmatmul.mubr.msk.bf16.vlgmr.msra.gmra.mxu0 %vm445_vm1, %v2142_v27 }
  0x57   : > { %2300 = vmatprep.mubr.msk.bf16.mxu0 %vm445_vm1, %v2143_v59 }
  0x5e   : > { %2301 = vmatmul.mubr.msk.bf16.gmra.mxu0 %vm445_vm1, %v2144_v2 }
  0xd3   : > { %v2218_v5 = vpop.f32.mrf.mxu0 }
  0xd4   : > { %v2222_v3 = vpop.f32.mrf.mxu1 }
  0xd5   : > { %v496_v8 = vpop.f32.mrf.mxu0 }
  0xd6   : > { %v512_v4 = vpop.f32.mrf.mxu1 }
  0xd7   : > { %v2219_v11 = vpop.f32.mrf.mxu0 }
  0xd8   : > { %v2696_v6 = vpop.f32.mrf.mxu1 }
  0xd9   : > { %v499_v15 = vpop.f32.mrf.mxu0 }
  0xda   : > { %v2698_v7 = vpop.f32.mrf.mxu1 }
  0xdc   : > { %v2228_v9 = vpop.f32.mrf.mxu1 }
  0xdd   : > { %v605_v14 = vadd.f32 %v2228_v9, %v2218_v5 }
  0xde   : > { %v596_v10 = vpop.f32.mrf.mxu1 }
  0xdf   : > { %v597_v47 = vadd.f32 %v596_v10, %v496_v8 }
  0xe0   : > { %v2229_v12 = vpop.f32.mrf.mxu1 }
  0xe1   : > { %v608_v50 = vadd.f32 %v2229_v12, %v2219_v11 }
  0xe2   : > { %v599_v13 = vpop.f32.mrf.mxu1 }
  0xe3   : > { %v600_v54 = vadd.f32 %v599_v13, %v499_v15 }
  0xe4   : > { %v2232_v16 = vpop.f32.mrf.mxu1  ;;  %v2238_v43 = vpop.f32.mrf.mxu0 }
  0xe5   : > { %v854_v49 = vadd.f32 %v2238_v43, %v605_v14  ;;  %v621_v59 = vadd.f32 %v2232_v16, %v2222_v3 }
  0xe6   : > { %v612_v17 = vpop.f32.mrf.mxu1  ;;  %v821_v18 = vpop.f32.mrf.mxu0 }
  0xe7   : > { %v852_v53 = vadd.f32 %v821_v18, %v597_v47  ;;  %v613_v1 = vadd.f32 %v612_v17, %v512_v4 }
  0xe8   : > { %v2233_v19 = vpop.f32.mrf.mxu1  ;;  %v2239_v20 = vpop.f32.mrf.mxu0 }
  0xe9   : > { %v855_v56 = vadd.f32 %v2239_v20, %v608_v50  ;;  %v624_v12 = vadd.f32 %v2233_v19, %v2696_v6 }
  0xea   : > { %v615_v21 = vpop.f32.mrf.mxu1  ;;  %v824_v22 = vpop.f32.mrf.mxu0 }
  0xeb   : > { %v853_v61 = vadd.f32 %v824_v22, %v600_v54  ;;  %v616_v16 = vadd.f32 %v615_v21, %v2698_v7 }
  0xec   : > { %v2248_v23 = vpop.f32.mrf.mxu1 }
  0xed   : > { %v972_v38 = vadd.f32 %v2248_v23, %v854_v49 }
  0xee   : > { %v939_v24 = vpop.f32.mrf.mxu1  ;;  %v2242_v25 = vpop.f32.mrf.mxu0 }
  0xef   : > { %v970_v57 = vadd.f32 %v939_v24, %v852_v53  ;;  %v858_v11 = vadd.f32 %v2242_v25, %v621_v59 }
  0xf0   : > { %v2249_v26 = vpop.f32.mrf.mxu1  ;;  %v837_v28 = vpop.f32.mrf.mxu0 }
  0xf1   : > { %v973_v63 = vadd.f32 %v2249_v26, %v855_v56  ;;  %v856_v3 = vadd.f32 %v837_v28, %v613_v1  ;;  %v2150_v56 = vld [vmem:[%s2776_s6] ss:$0 sm:$0xff] }
  0xf2   : > { %v942_v29 = vpop.f32.mrf.mxu1  ;;  %v2243_v30 = vpop.f32.mrf.mxu0 }
  0xf3   : > { %v971_v8 = vadd.f32 %v942_v29, %v853_v61  ;;  %v859_v26 = vadd.f32 %v2243_v30, %v624_v12 }
  0xf4   : > { %v2252_v31 = vpop.f32.mrf.mxu1  ;;  %v2700_v32 = vpop.f32.mrf.mxu0 }
  0xf5   : > { %v976_v20 = vadd.f32 %v2252_v31, %v858_v11  ;;  %v857_v7 = vadd.f32 %v2700_v32, %v616_v16 }
  0xf6   : > { %v955_v33 = vpop.f32.mrf.mxu1  ;;  %v2258_v34 = vpop.f32.mrf.mxu0 }
  0xf7   : > { %v1090_v62 = vadd.f32 %v2258_v34, %v972_v38  ;;  %v974_v29 = vadd.f32 %v955_v33, %v856_v3 }
  0xf8   : > { %v2253_v35 = vpop.f32.mrf.mxu1  ;;  %v1057_v36 = vpop.f32.mrf.mxu0 }
  0xf9   : > { %v1088_v5 = vadd.f32 %v1057_v36, %v970_v57  ;;  %v977_v28 = vadd.f32 %v2253_v35, %v859_v26 }
  0xfa   : > { %v2259_v37 = vpop.f32.mrf.mxu0  ;;  %v2702_v39 = vpop.f32.mrf.mxu1 }
  0xfb   : > { %v1091_v15 = vadd.f32 %v2259_v37, %v973_v63  ;;  %v975_v33 = vadd.f32 %v2702_v39, %v857_v7 }
  0xfc   : > { %v1060_v27 = vpop.f32.mrf.mxu0  ;;  %v2268_v41 = vpop.f32.mrf.mxu1 }
  0xfd   : > { %v1320_v9 = vadd.f32 %v2268_v41, %v1090_v62  ;;  %v1089_v4 = vadd.f32 %v1060_v27, %v971_v8 }
  0xfe   : > { %v2262_v40 = vpop.f32.mrf.mxu0  ;;  %v1287_v44 = vpop.f32.mrf.mxu1 }
  0xff   : > { %v1318_v43 = vadd.f32 %v1287_v44, %v1088_v5  ;;  %v1094_v21 = vadd.f32 %v2262_v40, %v976_v20 }
 0x100   : > { %v1073_v42 = vpop.f32.mrf.mxu0  ;;  %v2269_v46 = vpop.f32.mrf.mxu1 }
 0x101   : > { %v1321_v23 = vadd.f32 %v2269_v46, %v1091_v15  ;;  %v1092_v30 = vadd.f32 %v1073_v42, %v974_v29  ;;  %v2720_v46 = vld [vmem:[%s2775_s5] ss:$0 sm:$0xff] }
 0x102   : > { %v2704_v45 = vpop.f32.mrf.mxu0  ;;  %v1290_v51 = vpop.f32.mrf.mxu1 }
 0x103   : > { %v1319_v36 = vadd.f32 %v1290_v51, %v1089_v4  ;;  %v1095_v49 = vadd.f32 %v2704_v45, %v977_v28 }
 0x104   : > { %v2706_v48 = vpop.f32.mrf.mxu0  ;;  %v2272_v58 = vpop.f32.mrf.mxu1 }
 0x105   : > { %v1324_v44 = vadd.f32 %v2272_v58, %v1094_v21  ;;  %v1093_v54 = vadd.f32 %v2706_v48, %v975_v33 }
 0x106   : > { %v2278_v52 = vpop.f32.mrf.mxu0  ;;  %v1303_v0 = vpop.f32.mrf.mxu1 }
 0x107   : > { %v1439_v17 = vadd.f32 %v2278_v52, %v1320_v9  ;;  %v1322_v42 = vadd.f32 %v1303_v0, %v1092_v30 }
 0x108   : > { %v1406_v55 = vpop.f32.mrf.mxu0  ;;  %v2273_v10 = vpop.f32.mrf.mxu1 }
 0x109   : > { %v1437_v25 = vadd.f32 %v1406_v55, %v1318_v43  ;;  %v1325_v55 = vadd.f32 %v2273_v10, %v1095_v49 }
 0x10a   : > { %v2279_v60 = vpop.f32.mrf.mxu0  ;;  %v1306_v18 = vpop.f32.mrf.mxu1 }
 0x10b   : > { %v1440_v37 = vadd.f32 %v2279_v60, %v1321_v23  ;;  %v1323_v62 = vadd.f32 %v1306_v18, %v1093_v54 }
 0x10c   : > { %v1409_v2 = vpop.f32.mrf.mxu0  ;;  %v2288_v24 = vpop.f32.mrf.mxu1 }
 0x10d   : > { %v1558_v6 = vadd.f32 %v2288_v24, %v1439_v17  ;;  %v1438_v47 = vadd.f32 %v1409_v2, %v1319_v36 }
 0x10e   : > { %v2282_v13 = vpop.f32.mrf.mxu0  ;;  %v1525_v19 = vpop.f32.mrf.mxu1 }
 0x10f   : > { %v1556_v27 = vadd.f32 %v1525_v19, %v1437_v25  ;;  %v1443_v38 = vadd.f32 %v2282_v13, %v1324_v44 }
 0x110   : > { %v1422_v22 = vpop.f32.mrf.mxu0  ;;  %v2289_v41 = vpop.f32.mrf.mxu1 }
 0x111   : > { %v1559_v35 = vadd.f32 %v2289_v41, %v1440_v37  ;;  %v1441_v61 = vadd.f32 %v1422_v22, %v1322_v42 }
 0x112   : > { %v2283_v34 = vpop.f32.mrf.mxu0  ;;  %v1528_v40 = vpop.f32.mrf.mxu1 }
 0x113   : > { %v1557_v52 = vadd.f32 %v1528_v40, %v1438_v47  ;;  %v1444_v9 = vadd.f32 %v2283_v34, %v1325_v55 }
 0x114   : > { %v1425_v31 = vpop.f32.mrf.mxu0  ;;  %v2292_v53 = vpop.f32.mrf.mxu1 }
 0x115   : > { %v1562_v0 = vadd.f32 %v2292_v53, %v1443_v38  ;;  %v1442_v18 = vadd.f32 %v1425_v31, %v1323_v62 }
 0x116   : > { %v2298_v14 = vpop.f32.mrf.mxu0  ;;  %v1541_v60 = vpop.f32.mrf.mxu1 }
 0x117   : > { %v1788_v32 = vadd.f32 %v2298_v14, %v1558_v6  ;;  %v1560_v10 = vadd.f32 %v1541_v60, %v1441_v61 }
 0x118   : > { %v1755_v50 = vpop.f32.mrf.mxu0  ;;  %v2293_v8 = vpop.f32.mrf.mxu1 }
 0x119   : > { %v1803_v39 = vadd.f32 %v2720_v46, %v1788_v32  ;;  %v1786_v51 = vadd.f32 %v1755_v50, %v1556_v27  ;;  %v1563_v16 = vadd.f32 %v2293_v8, %v1444_v9 }
 0x11a   : > { %v2299_v57 = vpop.f32.mrf.mxu0  ;;  %v1544_v43 = vpop.f32.mrf.mxu1 }
 0x11b   : > { %v1811_v58 = vmax.f32 %v1803_v39, 0.0  ;;  %v1801_v45 = vadd.f32 %v2720_v46, %v1786_v51  ;;  %v1789_v59 = vadd.f32 %v2299_v57, %v1559_v35  ;;  %v1561_v24 = vadd.f32 %v1544_v43, %v1442_v18 }
 0x11c   : > { %v1758_v63 = vpop.f32.mrf.mxu0 }
 0x11d   : > { %v1826_v1 = vmul.f32 %v2150_v56, %v1811_v58  ;;  %v1809_v2 = vmax.f32 %v1801_v45, 0.0  ;;  %v1804_v48 = vadd.f32 %v2720_v46, %v1789_v59  ;;  %v1787_v5 = vadd.f32 %v1758_v63, %v1557_v52 }
 0x11e   : > { %v2302_v3 = vpop.f32.mrf.mxu0 }
 0x11f   : > { %v2163_v11 = vpack.c.bf16 %v1826_v1, %v1826_v1  ;;  %v1824_v12 = vmul.f32 %v2150_v56, %v1809_v2  ;;  %v1812_v13 = vmax.f32 %v1804_v48, 0.0  ;;  %v1802_v15 = vadd.f32 %v2720_v46, %v1787_v5 }
 0x120   : > { %v1792_v17 = vadd.f32 %v2302_v3, %v1562_v0  ;;  %v1771_v23 = vpop.f32.mrf.mxu0 }
 0x121   : > { %1867 = vst.msk [vmem:[%s2738_s30 + $0x8] sm:$0xf] %vm1864_vm5, %v2163_v11  ;;  %v2161_v20 = vpack.c.bf16 %v1824_v12, %v1824_v12  ;;  %v1827_v22 = vmul.f32 %v2150_v56, %v1812_v13  ;;  %v1810_v4 = vmax.f32 %v1802_v15, 0.0  ;;  %v1790_v25 = vadd.f32 %v1771_v23, %v1560_v10 }
 0x122   : > { %v1807_v34 = vadd.f32 %v2720_v46, %v1792_v17  ;;  %v2303_v36 = vpop.f32.mrf.mxu0 }
 0x123   : > { %1865 = vst.msk [vmem:[%s2738_s30] sm:$0xf] %vm1864_vm5, %v2161_v20  ;;  %v2164_v26 = vpack.c.bf16 %v1827_v22, %v1827_v22  ;;  %v1825_v29 = vmul.f32 %v2150_v56, %v1810_v4  ;;  %v1805_v7 = vadd.f32 %v2720_v46, %v1790_v25  ;;  %v1793_v21 = vadd.f32 %v2303_v36, %v1563_v16 }
 0x124   : > { %v1815_v19 = vmax.f32 %v1807_v34, 0.0  ;;  %v1774_v28 = vpop.f32.mrf.mxu0 }
 0x125   : > { %1868 = vst.msk [vmem:[%s2738_s30 + $0xc] sm:$0xf] %vm1864_vm5, %v2164_v26  ;;  %v2162_v6 = vpack.c.bf16 %v1825_v29, %v1825_v29  ;;  %v1813_v37 = vmax.f32 %v1805_v7, 0.0  ;;  %v1808_v27 = vadd.f32 %v2720_v46, %v1793_v21  ;;  %v1791_v41 = vadd.f32 %v1774_v28, %v1561_v24 }
 0x126   : > { %v1830_v31 = vmul.f32 %v2150_v56, %v1815_v19 }
 0x127   : > { %1866 = vst.msk [vmem:[%s2738_s30 + $0x4] sm:$0xf] %vm1864_vm5, %v2162_v6  ;;  %v1828_v33 = vmul.f32 %v2150_v56, %v1813_v37  ;;  %v1816_v44 = vmax.f32 %v1808_v27, 0.0  ;;  %v1806_v14 = vadd.f32 %v2720_v46, %v1791_v41 }
 0x128   : > { %v2167_v30 = vpack.c.bf16 %v1830_v31, %v1830_v31 }
 0x129   : > { %v2165_v47 = vpack.c.bf16 %v1828_v33, %v1828_v33  ;;  %v1831_v32 = vmul.f32 %v2150_v56, %v1816_v44  ;;  %v1814_v35 = vmax.f32 %v1806_v14, 0.0 }
 0x12a   : > { %1871 = vst.msk [vmem:[%s2738_s30 + $0x18] sm:$0xf] %vm1864_vm5, %v2167_v30 }
 0x12b   : > { %1869 = vst.msk [vmem:[%s2738_s30 + $0x10] sm:$0xf] %vm1864_vm5, %v2165_v47  ;;  %v2168_v40 = vpack.c.bf16 %v1831_v32, %v1831_v32  ;;  %v1829_v49 = vmul.f32 %v2150_v56, %v1814_v35 }
 0x12d   : > { %1872 = vst.msk [vmem:[%s2738_s30 + $0x1c] sm:$0xf] %vm1864_vm5, %v2168_v40  ;;  %v2166_v42 = vpack.c.bf16 %v1829_v49, %v1829_v49 }
 0x12f   : > { %1870 = vst.msk [vmem:[%s2738_s30 + $0x14] sm:$0xf] %vm1864_vm5, %v2166_v42 }
 0x130 PF: > { %s17_s26 = sadd.s32 1, %s2387_s26   ;;  %s2781_s24 = smov %s2383_s25 }
 0x131   : > { %p14_p6 = scmp.ge.s32.totalorder %s17_s26, 4   ;;  %s2782_s25 = smov %s2784_s27 }
 0x133   :  { %16 = sbr.rel (!%p14_p6) target bundleno = 2 (0x2), region = 106 }

</bundles_post_ra>
